<compile_context>
chip_gen: v7x
topology: tpu7x:2x2x1
jax: 0.10.0
libtpu: 0.0.40
codegen_flags: <defaults>
</compile_context>

<pallas_src>
import functools

import jax
import jax.numpy as jnp
from jax.experimental import pallas as pl
from jax.experimental.pallas import tpu as pltpu


def _max_xcorr_kernel(x_ref, wf_ref, b_ref, o_ref, *, K, L_out, B, time_chunk):
    """One batch-block of B samples per grid step.

    x_ref:  (B, C, L)   input samples for this step
    wf_ref: (S, K*C)    im2col-flattened shapelet weights (resident)
    b_ref:  (1, S)      conv bias (resident)
    o_ref:  (B, S)      lane-dense output block
    """
    wf = wf_ref[...]                                        # (S, K*C)

    rows = []
    for bb in range(B):                                     # static -> unrolled
        xb = x_ref[bb]                                      # (C, L)
        m = None
        # Chunk the time axis with a running max to bound vreg/VMEM pressure.
        for start in range(0, L_out, time_chunk):
            clen = min(time_chunk, L_out - start)
            # im2col patch: patch[k*C + c, t] = xb[c, start + t + k]
            patch = jnp.concatenate(
                [xb[:, start + k:start + k + clen] for k in range(K)], axis=0
            )                                               # (K*C, clen)
            acc = jnp.dot(wf, patch,
                          preferred_element_type=jnp.float32)   # (S, clen) f32
            part = jnp.max(acc, axis=1)                     # (S,)
            m = part if m is None else jnp.maximum(m, part)
        rows.append(m)

    res = jnp.stack(rows, axis=0)                           # (B, S) f32
    # Bias is constant over time: add it after the max (cheaper, same result).
    o_ref[...] = (res + b_ref[...]).astype(o_ref.dtype)


def max_cross_correlation(x, w, b, *, block_batch=8, time_chunk=512):
    """Pallas implementation of MaxCrossCorrelationBlock.forward.

    x: (N, C, L) float32 (or bf16)
    w: (S, C, K) conv1d weight
    b: (S,)      conv1d bias
    returns: (N, 1, S), same dtype as x
    """
    N, C, L = x.shape
    S, Cw, K = w.shape
    assert C == Cw, "in_channels mismatch"
    L_out = L - K + 1
    assert L_out >= 1, "time series shorter than shapelet"

    # Batch block size: keep it a clean divisor situation (either all of N for
    # small N, or 8 which keeps the (B, S) output block sublane-aligned).
    B = N if N < block_batch else block_batch
    N_pad = ((N + B - 1) // B) * B
    if N_pad != N:
        x = jnp.pad(x, ((0, N_pad - N), (0, 0), (0, 0)))

    # im2col weight flattening: wf[s, k*C + c] = w[s, c, k]
    wf = jnp.transpose(w, (0, 2, 1)).reshape(S, K * C)
    b2 = b.reshape(1, S)

    kernel = functools.partial(
        _max_xcorr_kernel, K=K, L_out=L_out, B=B, time_chunk=time_chunk
    )

    out2d = pl.pallas_call(
        kernel,
        out_shape=jax.ShapeDtypeStruct((N_pad, S), x.dtype),
        grid_spec=pltpu.PrefetchScalarGridSpec(
            num_scalar_prefetch=0,
            grid=(N_pad // B,),
            in_specs=[
                pl.BlockSpec((B, C, L), lambda n: (n, 0, 0)),     # B samples
                pl.BlockSpec((S, K * C), lambda n: (0, 0)),       # weights, resident
                pl.BlockSpec((1, S), lambda n: (0, 0)),           # bias, resident
            ],
            out_specs=pl.BlockSpec((B, S), lambda n: (n, 0)),     # lane-dense output
        ),
        compiler_params=pltpu.CompilerParams(
            dimension_semantics=("parallel",),                    # shard over TCs
        ),
    )(x, wf, b2)

    return out2d[:N].reshape(N, 1, S)


def _reference(x, w, b):
    """Pure-JAX reference mirroring the PyTorch forward."""
    out = jax.lax.conv_general_dilated(
        x, w, window_strides=(1,), padding="VALID",
        dimension_numbers=("NCH", "OIH", "NCH"),
    )                                            # (N, S, L_out)
    out = out + b[None, :, None]
    out = jnp.max(out, axis=2, keepdims=True)    # (N, S, 1)
    return jnp.transpose(out, (0, 2, 1))         # (N, 1, S)


if __name__ == "__main__":
    # Small, module-consistent shapes.
    N, C, L = 2, 4, 16          # num_samples, in_channels, len_ts
    K, S = 8, 32                # shapelets_size, num_shapelets

    key = jax.random.PRNGKey(0)
    kx, kw, kb = jax.random.split(key, 3)

    x = jax.random.normal(kx, (N, C, L), dtype=jnp.float32)
    # Deterministic synthetic parameters (Conv1d-shaped weight & bias).
    w = jax.random.normal(kw, (S, C, K), dtype=jnp.float32) * 0.1
    b = jax.random.normal(kb, (S,), dtype=jnp.float32) * 0.1

    out = max_cross_correlation(x, w, b)
    out = jax.block_until_ready(out)

    ref = _reference(x, w, b)
    assert out.shape == (N, 1, S), out.shape
    assert jnp.allclose(out, ref, atol=1e-4, rtol=1e-4), "mismatch vs reference"

    print("KERNEL_OK")
</pallas_src>

<mosaic_0001>
module attributes {stable_mosaic.version = 11 : i64} {
  func.func @_max_xcorr_kernel(%arg0: i32, %arg1: memref<2x4x16xf32, #tpu.memory_space<vmem>>, %arg2: memref<32x32xf32, #tpu.memory_space<vmem>>, %arg3: memref<1x32xf32, #tpu.memory_space<vmem>>, %arg4: memref<2x32xf32, #tpu.memory_space<vmem>>) attributes {dimension_semantics = [#tpu.dimension_semantics<parallel>], iteration_bounds = array<i64: 1>, scalar_prefetch = 0 : i64, scratch_operands = 0 : i64, tpu.core_type = #tpu.core_type<tc>, window_params = [{transform_indices = @transform_0, window_bounds = array<i64: 2, 4, 16>}, {pipeline_mode = #tpu.pipeline_mode<synchronous>, transform_indices = @transform_1, window_bounds = array<i64: 32, 32>}, {pipeline_mode = #tpu.pipeline_mode<synchronous>, transform_indices = @transform_2, window_bounds = array<i64: 1, 32>}, {transform_indices = @transform_3, window_bounds = array<i64: 2, 32>}]} {
    %c0 = arith.constant 0 : index
    %c0_0 = arith.constant 0 : index
    %0 = vector.load %arg2[%c0, %c0_0] : memref<32x32xf32, #tpu.memory_space<vmem>>, vector<32x32xf32>
    %c0_1 = arith.constant 0 : index
    %c0_2 = arith.constant 0 : index
    %c0_3 = arith.constant 0 : index
    %1 = vector.load %arg1[%c0_1, %c0_2, %c0_3] : memref<2x4x16xf32, #tpu.memory_space<vmem>>, vector<1x4x16xf32>
    %2 = vector.shape_cast %1 : vector<1x4x16xf32> to vector<4x16xf32>
    %3 = vector.extract_strided_slice %2 {offsets = [0, 0], sizes = [4, 9], strides = [1, 1]} : vector<4x16xf32> to vector<4x9xf32>
    %4 = vector.extract_strided_slice %2 {offsets = [0, 1], sizes = [4, 9], strides = [1, 1]} : vector<4x16xf32> to vector<4x9xf32>
    %5 = vector.extract_strided_slice %2 {offsets = [0, 2], sizes = [4, 9], strides = [1, 1]} : vector<4x16xf32> to vector<4x9xf32>
    %6 = vector.extract_strided_slice %2 {offsets = [0, 3], sizes = [4, 9], strides = [1, 1]} : vector<4x16xf32> to vector<4x9xf32>
    %7 = vector.extract_strided_slice %2 {offsets = [0, 4], sizes = [4, 9], strides = [1, 1]} : vector<4x16xf32> to vector<4x9xf32>
    %8 = vector.extract_strided_slice %2 {offsets = [0, 5], sizes = [4, 9], strides = [1, 1]} : vector<4x16xf32> to vector<4x9xf32>
    %9 = vector.extract_strided_slice %2 {offsets = [0, 6], sizes = [4, 9], strides = [1, 1]} : vector<4x16xf32> to vector<4x9xf32>
    %10 = vector.extract_strided_slice %2 {offsets = [0, 7], sizes = [4, 9], strides = [1, 1]} : vector<4x16xf32> to vector<4x9xf32>
    %11 = tpu.concatenate %3, %4, %5, %6, %7, %8, %9, %10 in 0 : vector<4x9xf32>, vector<4x9xf32>, vector<4x9xf32>, vector<4x9xf32>, vector<4x9xf32>, vector<4x9xf32>, vector<4x9xf32>, vector<4x9xf32> -> vector<32x9xf32>
    %cst = arith.constant dense<0.000000e+00> : vector<32x9xf32>
    %12 = tpu.matmul %0, %11, %cst {dimension_numbers = #tpu.dot_dimension_numbers<[1], [0], [0], [1], [0, 0, 1, 1], [], []>} : vector<32x32xf32>, vector<32x9xf32>, vector<32x9xf32> -> vector<32x9xf32>
    %cst_4 = arith.constant dense<0xFF800000> : vector<32xf32>
    %13 = vector.multi_reduction <maximumf>, %12, %cst_4 [1] : vector<32x9xf32> to vector<32xf32>
    %c1 = arith.constant 1 : index
    %c0_5 = arith.constant 0 : index
    %c0_6 = arith.constant 0 : index
    %14 = vector.load %arg1[%c1, %c0_5, %c0_6] : memref<2x4x16xf32, #tpu.memory_space<vmem>>, vector<1x4x16xf32>
    %15 = vector.shape_cast %14 : vector<1x4x16xf32> to vector<4x16xf32>
    %16 = vector.extract_strided_slice %15 {offsets = [0, 0], sizes = [4, 9], strides = [1, 1]} : vector<4x16xf32> to vector<4x9xf32>
    %17 = vector.extract_strided_slice %15 {offsets = [0, 1], sizes = [4, 9], strides = [1, 1]} : vector<4x16xf32> to vector<4x9xf32>
    %18 = vector.extract_strided_slice %15 {offsets = [0, 2], sizes = [4, 9], strides = [1, 1]} : vector<4x16xf32> to vector<4x9xf32>
    %19 = vector.extract_strided_slice %15 {offsets = [0, 3], sizes = [4, 9], strides = [1, 1]} : vector<4x16xf32> to vector<4x9xf32>
    %20 = vector.extract_strided_slice %15 {offsets = [0, 4], sizes = [4, 9], strides = [1, 1]} : vector<4x16xf32> to vector<4x9xf32>
    %21 = vector.extract_strided_slice %15 {offsets = [0, 5], sizes = [4, 9], strides = [1, 1]} : vector<4x16xf32> to vector<4x9xf32>
    %22 = vector.extract_strided_slice %15 {offsets = [0, 6], sizes = [4, 9], strides = [1, 1]} : vector<4x16xf32> to vector<4x9xf32>
    %23 = vector.extract_strided_slice %15 {offsets = [0, 7], sizes = [4, 9], strides = [1, 1]} : vector<4x16xf32> to vector<4x9xf32>
    %24 = tpu.concatenate %16, %17, %18, %19, %20, %21, %22, %23 in 0 : vector<4x9xf32>, vector<4x9xf32>, vector<4x9xf32>, vector<4x9xf32>, vector<4x9xf32>, vector<4x9xf32>, vector<4x9xf32>, vector<4x9xf32> -> vector<32x9xf32>
    %cst_7 = arith.constant dense<0.000000e+00> : vector<32x9xf32>
    %25 = tpu.matmul %0, %24, %cst_7 {dimension_numbers = #tpu.dot_dimension_numbers<[1], [0], [0], [1], [0, 0, 1, 1], [], []>} : vector<32x32xf32>, vector<32x9xf32>, vector<32x9xf32> -> vector<32x9xf32>
    %cst_8 = arith.constant dense<0xFF800000> : vector<32xf32>
    %26 = vector.multi_reduction <maximumf>, %25, %cst_8 [1] : vector<32x9xf32> to vector<32xf32>
    %27 = vector.shape_cast %13 : vector<32xf32> to vector<1x32xf32>
    %28 = vector.shape_cast %26 : vector<32xf32> to vector<1x32xf32>
    %29 = tpu.concatenate %27, %28 in 0 : vector<1x32xf32>, vector<1x32xf32> -> vector<2x32xf32>
    %c0_9 = arith.constant 0 : index
    %c0_10 = arith.constant 0 : index
    %30 = vector.load %arg3[%c0_9, %c0_10] : memref<1x32xf32, #tpu.memory_space<vmem>>, vector<1x32xf32>
    %31 = vector.broadcast %30 : vector<1x32xf32> to vector<2x32xf32>
    %32 = arith.addf %29, %31 : vector<2x32xf32>
    %c0_11 = arith.constant 0 : index
    %c0_12 = arith.constant 0 : index
    %33 = vector.load %arg4[%c0_11, %c0_12] : memref<2x32xf32, #tpu.memory_space<vmem>>, vector<2x32xf32>
    tpu.vector_store %arg4[%c0_11, %c0_12], %32 {strides = array<i32>} : memref<2x32xf32, #tpu.memory_space<vmem>>, vector<2x32xf32>,
    return
  }
  func.func @transform_0(%arg0: i32) -> (i32, i32, i32) {
    %c0_i32 = arith.constant 0 : i32
    %c0_i32_0 = arith.constant 0 : i32
    %c0_i32_1 = arith.constant 0 : i32
    return %arg0, %c0_i32, %c0_i32_0 : i32, i32, i32
  }
  func.func @transform_1(%arg0: i32) -> (i32, i32) {
    %c0_i32 = arith.constant 0 : i32
    %c0_i32_0 = arith.constant 0 : i32
    %c0_i32_1 = arith.constant 0 : i32
    return %c0_i32, %c0_i32_0 : i32, i32
  }
  func.func @transform_2(%arg0: i32) -> (i32, i32) {
    %c0_i32 = arith.constant 0 : i32
    %c0_i32_0 = arith.constant 0 : i32
    %c0_i32_1 = arith.constant 0 : i32
    return %c0_i32, %c0_i32_0 : i32, i32
  }
  func.func @transform_3(%arg0: i32) -> (i32, i32) {
    %c0_i32 = arith.constant 0 : i32
    %c0_i32_0 = arith.constant 0 : i32
    return %arg0, %c0_i32 : i32, i32
  }
}

</mosaic_0001>

<bundles_post_ra>
// kernel: tpu_custom_call.1
= control target key start
LH: loop header
LB: loop body
LE: loop exit
PB: predicated region body
PF: predicated region fallthrough
CT: control target
= control target key end

     0   :  { %8 = vsyncpa [#allocation3], 0  ;;  %s684_s0 = inlined_call_operand.hbm [shape: f32[2,4,16], index: 0, kind: input, shape index: {}]   ;;  %s685_s1 = inlined_call_operand.hbm [shape: f32[32,32], index: 1, kind: input, shape index: {}]   ;;  %s686_s2 = inlined_call_operand.vmem [shape: f32[1,32], index: 2, kind: input, shape index: {}]   ;;  %s687_s3 = inlined_call_operand.hbm [shape: f32[2,32], index: 3, kind: output, shape index: {}]  }
   0x1   :  { %9 = vsyncpa [#allocation6], 0 }
   0x2   :  { %10 = vsyncpa [#allocation4], 0  ;;  %s587_s12 = smov [#allocation2]   ;;  %s515_s16 = scalar_lea.hbm %s684_s0, 128 }
   0x3   :  { %s16_s13 = sshll.u32 %s587_s12, 4  ;;  %p516_p0 = scmp.ne.s32.totalorder %s684_s0, %s515_s16  ;;  %s17_s13 = int_to_ptr.vmem [resolvable:$true] %s16_s13 }
   0x4   :  { %p519_p1 = scmp.lt.u32.totalorder %s515_s16, %s684_s0 }
   0x6   :  { %p521_p2 = pnand %p519_p1, %p516_p0 }
   0x8   :  { %524 = shalt.err (!%p521_p2)
}
   0x9   :  { %s525_s21 = scalar_lea.vmem %s17_s13, 128  ;;  %p530_p4 = scmp.lt.s32.totalorder %s17_s13, %s17_s13 }
   0xa   :  { %p526_p3 = scmp.ne.s32.totalorder %s17_s13, %s525_s21  ;;  %p531_p5 = scmp.lt.s32.totalorder %s525_s21, %s525_s21 }
   0xc   :  { %p532_p6 = por %p531_p5, %p530_p4 }
   0xe   :  { %p533_p7 = pnand %p532_p6, %p526_p3 }
  0x10   :  { %536 = shalt.err (!%p533_p7)
}
  0x11   :  { %s588_s22 = smov 64   ;;  %s589_s23 = smov 4  }
  0x12   :  { %22 = dma.hbm_to_vmem [thread:$0]  %s684_s0, 128, %s17_s13, [#allocation3], %s588_s22, %s588_s22, %s589_s23  }
  0x13   :  { %s590_s26 = smov [#allocation5]   ;;  %s537_s30 = scalar_lea.hbm %s685_s1, 512 }
  0x14   :  { %s28_s27 = sshll.u32 %s590_s26, 4  ;;  %p538_p8 = scmp.ne.s32.totalorder %s685_s1, %s537_s30  ;;  %s29_s27 = int_to_ptr.vmem [resolvable:$true] %s28_s27 }
  0x15   :  { %p541_p9 = scmp.lt.u32.totalorder %s537_s30, %s685_s1 }
  0x17   :  { %p543_p10 = pnand %p541_p9, %p538_p8 }
  0x19   :  { %546 = shalt.err (!%p543_p10)
}
  0x1a   :  { %s547_s8 = scalar_lea.vmem %s29_s27, 512  ;;  %p552_p12 = scmp.lt.s32.totalorder %s29_s27, %s29_s27 }
  0x1b   :  { %p548_p11 = scmp.ne.s32.totalorder %s29_s27, %s547_s8  ;;  %p553_p13 = scmp.lt.s32.totalorder %s547_s8, %s547_s8 }
  0x1d   :  { %p554_p0 = por %p553_p13, %p552_p12 }
  0x1f   :  { %p555_p1 = pnand %p554_p0, %p548_p11 }
  0x21   :  { %558 = shalt.err (!%p555_p1)
}
  0x22   :  { %s591_s0 = smov 128   ;;  %s592_s9 = smov 8  }
  0x23   :  { %34 = dma.hbm_to_vmem [thread:$0]  %s685_s1, 512, %s29_s27, [#allocation6], %s591_s0, %s591_s0, %s592_s9  }
  0x24   :  { %581 = dma.done.wait [#allocation3], 128  }
  0x25   :  { %582 = vsyncadd [#allocation3], 4294967168 }
  0x26   :  { %583 = dma.done.wait [#allocation6], 512  }
  0x27   :  { %584 = vsyncadd [#allocation6], 4294966784  ;;  %v47_v0 = vld [vmem:[#allocation2] sm:$0xf]  ;;  %v188_v1 = vld [vmem:[#allocation2 + $0x4] sm:$0xf]  ;;  %v317_v59 = vlaneseq }
  0x28   :  { %v485_v2 = vpack.i.bf16 %v188_v1, %v47_v0  ;;  %v49_v3 = vrot.slane %v47_v0, 4  ;;  %v190_v4 = vrot.slane %v188_v1, 4  ;;  %s593_s12 = smov 124   ;;  %s594_s13 = smov 126   ;;  %v43_v6 = vld [vmem:[#allocation5] sm:$0xff]  ;;  %vm76_vm0 = vcmask 261120  }
  0x29   :  { %s595_s14 = smov 125   ;;  %s596_s15 = smov 127   ;;  %430 = vmatprep.mubr.msk.f32.mxu0 %vm76_vm0, %v43_v6  ;;  %444 = vmatprep.mubr.msk.f32.mxu1 %vm76_vm0, %v43_v6  ;;  %vm71_vm1 = vcmask 1043456   ;;  %v44_v40 = vld [vmem:[#allocation5 + $0x8] sm:$0xff]  ;;  %v45_v41 = vld [vmem:[#allocation5 + $0x10] sm:$0xff]  ;;  %v46_v42 = vld [vmem:[#allocation5 + $0x18] sm:$0xff] }
  0x2a   :  { %486 = vrot.lane.b32.xlu1 %v485_v2, %s593_s12  ;;  %481 = vrot.lane.b32.xlu0 %v485_v2, %s594_s13  ;;  %v495_v5 = vpack.i.bf16 %v190_v4, %v49_v3  ;;  %s597_s1 = smov 123   ;;  %s598_s16 = smov 122   ;;  %vm174_vm2 = vcmask 72704   ;;  %v318_v60 = vand.u32 127, %v317_v59  ;;  %vm328_vm3 = vcmask 130112  }
  0x2b   :  { %s599_s17 = smov 121   ;;  %vm335_vm4 = vcmask 195712   ;;  %vm342_vm5 = vcmask 261312   ;;  %vm369_vm6 = vcmask 1040384   ;;  %s600_s20 = smov [#allocation7]   ;;  %vm379_vm7 = vcmask 254976  }
  0x2c   :  { %v330_v63 = vadd.s32 4294967280, %v318_v60  ;;  %s387_s21 = sshll.u32 %s600_s20, 4  ;;  %s388_s21 = int_to_ptr.vmem [resolvable:$true] %s387_s21 }
  0x2d   :  { %s559_s22 = scalar_lea.vmem %s388_s21, 32  ;;  %p564_p3 = scmp.lt.s32.totalorder %s388_s21, %s388_s21 }
  0x2e   :  { %496 = vrot.lane.b32.xlu1 %v495_v5, %s595_s14  ;;  %491 = vrot.lane.b32.xlu0 %v495_v5, %s596_s15  ;;  %p560_p2 = scmp.ne.s32.totalorder %s388_s21, %s559_s22  ;;  %p565_p4 = scmp.lt.s32.totalorder %s559_s22, %s559_s22 }
  0x30   :  { %p566_p5 = por %p565_p4, %p564_p3 }
  0x32   :  { %506 = vrot.lane.b32.xlu0 %v495_v5, %s597_s1  ;;  %501 = vrot.lane.b32.xlu1 %v485_v2, %s598_s16  ;;  %p567_p6 = pnand %p566_p5, %p560_p2 }
  0x36   :  { %511 = vrot.lane.b32.xlu0 %v495_v5, %s599_s17  ;;  %v337_v5 = vadd.s32 4294967272, %v318_v60 }
  0x9c   :  { %v487_v7 = vpop.permute.xlu1 %486  ;;  %v482_v8 = vpop.permute.xlu0 %481 }
  0x9d   :  { %v484_v9 = vunpack.i.h.bf16 %v482_v8  ;;  %v483_v10 = vunpack.i.l.bf16 %v482_v8  ;;  %v489_v30 = vunpack.i.h.bf16 %v487_v7  ;;  %v488_v31 = vunpack.i.l.bf16 %v487_v7 }
  0xa0   :  { %v497_v11 = vpop.permute.xlu1 %496  ;;  %v492_v12 = vpop.permute.xlu0 %491 }
  0xa1   :  { %v499_v13 = vunpack.i.h.bf16 %v497_v11  ;;  %v498_v14 = vunpack.i.l.bf16 %v497_v11  ;;  %v494_v15 = vunpack.i.h.bf16 %v492_v12  ;;  %v493_v16 = vunpack.i.l.bf16 %v492_v12 }
  0xa3   :  { %v72_v17 = vsel %vm71_vm1, %v47_v0, %v493_v16  ;;  %v73_v18 = vsel %vm71_vm1, %v483_v10, %v498_v14  ;;  %v212_v19 = vsel %vm71_vm1, %v188_v1, %v494_v15  ;;  %v213_v20 = vsel %vm71_vm1, %v484_v9, %v499_v13 }
  0xa4   :  { %v507_v21 = vpop.permute.xlu0 %506  ;;  %v450_v22 = vpack.c.bf16 %v73_v18, %v72_v17  ;;  %v458_v23 = vpack.c.bf16 %v213_v20, %v212_v19  ;;  %v502_v24 = vpop.permute.xlu1 %501  ;;  %v320_v0 = vshrl.u32 %v317_v59, 7  ;;  %v323_v1 = vadd.s32 4294967288, %v318_v60 }
  0xa5   :  { %v509_v25 = vunpack.i.h.bf16 %v507_v21  ;;  %v508_v26 = vunpack.i.l.bf16 %v507_v21  ;;  %v504_v27 = vunpack.i.h.bf16 %v502_v24  ;;  %v503_v28 = vunpack.i.l.bf16 %v502_v24 }
  0xa6   :  { %451 = vmatprep.subr.bf16.mxu0 %v450_v22  ;;  %459 = vmatprep.subr.bf16.mxu1 %v458_v23  ;;  %v321_v4 = vsub.s32 %v318_v60, %v320_v0  ;;  %v333_v6 = vsub.s32 %v330_v63, %v320_v0  ;;  %v326_v7 = vsub.s32 %v323_v1, %v320_v0 }
  0xa7   :  { %453 = vmatpush3.bf16.msra.mxu0 %v450_v22  ;;  %461 = vmatpush3.bf16.msra.mxu1 %v458_v23  ;;  %v74_v34 = vsel %vm71_vm1, %v488_v31, %v508_v26  ;;  %v214_v36 = vsel %vm71_vm1, %v489_v30, %v509_v25  ;;  %v340_v12 = vsub.s32 %v337_v5, %v320_v0  ;;  %v405_v25 = vld [vmem:[%s686_s2] ss:$0 sm:$0xff] }
  0xa8   :  { %v512_v29 = vpop.permute.xlu0 %511 }
  0xa9   :  { %v514_v32 = vunpack.i.h.bf16 %v512_v29  ;;  %v513_v33 = vunpack.i.l.bf16 %v512_v29 }
  0xab   :  { %v75_v35 = vsel %vm71_vm1, %v503_v28, %v513_v33  ;;  %v215_v37 = vsel %vm71_vm1, %v504_v27, %v514_v32 }
  0xac   :  { %v454_v38 = vpack.c.bf16 %v75_v35, %v74_v34  ;;  %v462_v39 = vpack.c.bf16 %v215_v37, %v214_v36 }
  0xae   :  { %455 = vmatprep.subr.bf16.mxu0 %v454_v38  ;;  %463 = vmatprep.subr.bf16.mxu1 %v462_v39 }
  0xaf   :  { %457 = vmatpush3.bf16.msra.mxu0 %v454_v38  ;;  %465 = vmatpush3.bf16.msra.mxu1 %v462_v39 }
  0xb2   :  { %431 = vmatmul.mubr.msk.f32.vlgmr.msra.gmra.mrb[0].mxu0 %vm76_vm0, %v44_v40  ;;  %445 = vmatmul.mubr.msk.f32.vlgmr.msra.gmra.mrb[0].mxu1 %vm76_vm0, %v44_v40 }
  0xb3   :  { %433 = vmatprep.mubr.msk.f32.mxu0 %vm76_vm0, %v45_v41  ;;  %447 = vmatprep.mubr.msk.f32.mxu1 %vm76_vm0, %v45_v41 }
  0xb6   :  { %434 = vmatmul.mubr.msk.f32.gmra.mrb[2].mxu0 %vm76_vm0, %v46_v42  ;;  %448 = vmatmul.mubr.msk.f32.gmra.mrb[2].mxu1 %vm76_vm0, %v46_v42 }
 0x185   :  { %v432_v43 = vpop.f32.mrb[0].mxu0  ;;  %v446_v44 = vpop.f32.mrb[0].mxu1 }
 0x186   :  { %v155_v45 = vpop.f32.mrb[1].mxu0  ;;  %v282_v46 = vpop.f32.mrb[1].mxu1  ;;  %v304_v47 = vsel %vm174_vm2, %v446_v44, -inf  ;;  %v178_v48 = vsel %vm174_vm2, %v432_v43, -inf }
 0x187   :  { %305 = vmax.xlane.f32.xlu1 %v304_v47  ;;  %179 = vmax.xlane.f32.xlu0 %v178_v48  ;;  %v301_v51 = vsel %vm174_vm2, %v282_v46, -inf  ;;  %v175_v52 = vsel %vm174_vm2, %v155_v45, -inf }
 0x189   :  { %v449_v49 = vpop.f32.mrb[2].mxu1  ;;  %v435_v50 = vpop.f32.mrb[2].mxu0 }
 0x18a   :  { %v165_v53 = vpop.f32.mrb[3].mxu0  ;;  %v292_v54 = vpop.f32.mrb[3].mxu1  ;;  %v310_v57 = vsel %vm174_vm2, %v449_v49, -inf  ;;  %v184_v58 = vsel %vm174_vm2, %v435_v50, -inf }
 0x18b   :  { %302 = vmax.xlane.f32.xlu0 %v301_v51  ;;  %176 = vmax.xlane.f32.xlu1 %v175_v52  ;;  %v307_v55 = vsel %vm174_vm2, %v292_v54, -inf  ;;  %v181_v56 = vsel %vm174_vm2, %v165_v53, -inf }
 0x18f   :  { %308 = vmax.xlane.f32.xlu1 %v307_v55  ;;  %182 = vmax.xlane.f32.xlu0 %v181_v56 }
 0x193   :  { %311 = vmax.xlane.f32.xlu1 %v310_v57  ;;  %185 = vmax.xlane.f32.xlu0 %v184_v58 }
 0x214   :  { %v306_v61 = vpop.xlane.xlu1 %305  ;;  %v180_v62 = vpop.xlane.xlu0 %179 }
 0x215   :  { %v356_v15 = vrot.slane %v306_v61, %v326_v7  ;;  %v327_v16 = vrot.slane %v180_v62, %v326_v7 }
 0x218   :  { %v303_v2 = vpop.xlane.xlu0 %302  ;;  %v177_v3 = vpop.xlane.xlu1 %176 }
 0x219   :  { %v352_v10 = vrot.slane %v303_v2, %v321_v4  ;;  %v322_v11 = vrot.slane %v177_v3, %v321_v4 }
 0x21b   :  { %v357_v19 = vsel %vm328_vm3, %v356_v15, %v352_v10  ;;  %v329_v20 = vsel %vm328_vm3, %v327_v16, %v322_v11 }
 0x21c   :  { %v309_v8 = vpop.xlane.xlu1 %308  ;;  %v183_v9 = vpop.xlane.xlu0 %182 }
 0x21d   :  { %v361_v13 = vrot.slane %v309_v8, %v333_v6  ;;  %v334_v14 = vrot.slane %v183_v9, %v333_v6 }
 0x21f   :  { %v362_v23 = vsel %vm335_vm4, %v361_v13, %v357_v19  ;;  %v336_v24 = vsel %vm335_vm4, %v334_v14, %v329_v20 }
 0x220   :  { %v312_v17 = vpop.xlane.xlu1 %311  ;;  %v186_v18 = vpop.xlane.xlu0 %185 }
 0x221   :  { %v366_v21 = vrot.slane %v312_v17, %v340_v12  ;;  %v341_v22 = vrot.slane %v186_v18, %v340_v12 }
 0x223   :  { %v367_v26 = vsel %vm342_vm5, %v366_v21, %v362_v23  ;;  %v343_v27 = vsel %vm342_vm5, %v341_v22, %v336_v24 }
 0x224   :  { %v370_v28 = vsel %vm369_vm6, %v343_v27, %v367_v26 }
 0x225   :  { %v378_v29 = vadd.f32 %v405_v25, %v370_v28 }
 0x227   :  { %380 = vst.msk [vmem:[#allocation7] sm:$0x3] %vm379_vm7, %v378_v29 }
 0x228   :  { %570 = shalt.err (!%p567_p6)
}
 0x229   :  { %s571_s2 = scalar_lea.hbm %s687_s3, 32 }
 0x22a   :  { %p572_p7 = scmp.ne.s32.totalorder %s687_s3, %s571_s2  ;;  %p575_p8 = scmp.lt.u32.totalorder %s571_s2, %s687_s3 }
 0x22c   :  { %p577_p9 = pnand %p575_p8, %p572_p7 }
 0x22e   :  { %580 = shalt.err (!%p577_p9)
}
 0x22f   :  { %390 = dma.vmem_to_hbm [thread:$0]  %s388_s21, 32, %s687_s3, [#allocation4]  }
 0x230   :  { %585 = dma.done.wait [#allocation4], 32  }
 0x231   :  { %586 = vsyncadd [#allocation4], 4294967264 }
 0x232   :  { %394 = vsyncpa [#allocation3], 1 }
 0x233   :  { %395 = vsyncpa [#allocation6], 1 }
 0x234   :  { %396 = vsyncpa [#allocation4], 1 }

</bundles_post_ra>
